<compile_context>
chip_gen: v7x
topology: tpu7x:2x2x1
jax: 0.10.0
libtpu: 0.0.40
codegen_flags: <defaults>
</compile_context>

<pallas_src>
import jax
import jax.numpy as jnp
from jax.experimental import pallas as pl
from jax.experimental.pallas import tpu as pltpu

# Deterministic "parameters" exactly as in MaskingLayer.__init__:
# scale_tensor_array[k] == k / 255.0 (ToTensor on uint8).
MASKING_LOW = 10.0 / 255.0
MASKING_HIGH = 30.0 / 255.0

TARGET_BLOCK_BYTES = 2 * 1024 * 1024   # ~2 MiB/block -> 4x = 8 MiB VMEM (safe on v5e)
MIN_GRID_STEPS = 8                     # keep both v7x TensorCores fed when possible


def masking_kernel(x_ref, o_ref):
    x = x_ref[...]
    keep = (x < MASKING_LOW) | (x > MASKING_HIGH)
    # Scalar 0.0 -> no materialized zeros broadcast.
    o_ref[...] = jnp.where(keep, x, 0.0).astype(o_ref.dtype)


def _pick_lane(total):
    """Largest multiple of 128 (<= 1024) dividing total, else 128 (needs pad)."""
    for lane in (1024, 512, 256, 128):
        if total % lane == 0:
            return lane
    return 128


@jax.jit
def masking_layer(x):
    """Elementwise masking. Any shape / float dtype; returns same shape/dtype."""
    orig_shape = x.shape
    orig_dtype = x.dtype
    total = x.size
    itemsize = jnp.dtype(orig_dtype).itemsize

    lane = _pick_lane(total)
    needs_pad = (total % lane) != 0

    flat = x.reshape(-1)
    rows = -(-total // lane)              # cdiv
    padded_total = rows * lane
    if needs_pad:                         # rare fallback; common path emits no pad
        flat = jnp.pad(flat, (0, padded_total - total))
    x2d = flat.reshape(rows, lane)

    # Block rows: multiple of 8 (or full dim), ~TARGET_BLOCK_BYTES per block,
    # but keep the grid long enough for v7x's two cores.
    if rows <= 8:
        block_rows = rows                 # full second-minor dim (constraint OK)
    else:
        by_bytes = max(8, TARGET_BLOCK_BYTES // (lane * itemsize))
        by_grid = max(8, -(-rows // MIN_GRID_STEPS))
        block_rows = max(8, (min(by_bytes, by_grid) // 8) * 8)

    grid = (pl.cdiv(rows, block_rows),)   # partial edge block is masked by Pallas

    out2d = pl.pallas_call(
        masking_kernel,
        out_shape=jax.ShapeDtypeStruct((rows, lane), orig_dtype),
        grid=grid,
        in_specs=[pl.BlockSpec((block_rows, lane), lambda i: (i, 0))],
        out_specs=pl.BlockSpec((block_rows, lane), lambda i: (i, 0)),
        compiler_params=pltpu.CompilerParams(
            dimension_semantics=("parallel",)
        ),
    )(x2d)

    out_flat = out2d.reshape(-1)
    if needs_pad:
        out_flat = out_flat[:total]
    return out_flat.reshape(orig_shape)


def reference(x):
    keep = (x < MASKING_LOW) | (MASKING_HIGH < x)
    return jnp.where(keep, x, jnp.zeros_like(x))


if __name__ == "__main__":
    key = jax.random.PRNGKey(0)
    # Small NCHW input; values in [0, 1) like ToTensor output.
    x = jax.random.uniform(key, (2, 4, 16, 16), dtype=jnp.float32)

    out = masking_layer(x)
    out = jax.block_until_ready(out)

    ref = jax.block_until_ready(reference(x))
    assert out.shape == x.shape and out.dtype == x.dtype
    assert jnp.allclose(out, ref), "mismatch vs reference"
    print("KERNEL_OK")
</pallas_src>

<mosaic_0001>
module attributes {stable_mosaic.version = 11 : i64} {
  func.func @masking_kernel(%arg0: i32, %arg1: memref<2x1024xf32, #tpu.memory_space<vmem>>, %arg2: memref<2x1024xf32, #tpu.memory_space<vmem>>) attributes {dimension_semantics = [#tpu.dimension_semantics<parallel>], iteration_bounds = array<i64: 1>, scalar_prefetch = 0 : i64, scratch_operands = 0 : i64, tpu.core_type = #tpu.core_type<tc>, window_params = [{transform_indices = @transform_0, window_bounds = array<i64: 2, 1024>}, {transform_indices = @transform_1, window_bounds = array<i64: 2, 1024>}]} {
    %c0 = arith.constant 0 : index
    %c0_0 = arith.constant 0 : index
    %0 = vector.load %arg1[%c0, %c0_0] : memref<2x1024xf32, #tpu.memory_space<vmem>>, vector<2x1024xf32>
    %cst = arith.constant 0.0392156877 : f32
    %1 = vector.broadcast %cst : f32 to vector<2x1024xf32>
    %2 = arith.cmpf olt, %0, %1 : vector<2x1024xf32>
    %cst_1 = arith.constant 0.117647059 : f32
    %3 = vector.broadcast %cst_1 : f32 to vector<2x1024xf32>
    %4 = arith.cmpf ogt, %0, %3 : vector<2x1024xf32>
    %5 = arith.ori %2, %4 : vector<2x1024xi1>
    %cst_2 = arith.constant 0.000000e+00 : f32
    %6 = vector.broadcast %cst_2 : f32 to vector<2x1024xf32>
    %7 = arith.select %5, %0, %6 : vector<2x1024xi1>, vector<2x1024xf32>
    %c0_3 = arith.constant 0 : index
    %c0_4 = arith.constant 0 : index
    %8 = vector.load %arg2[%c0_3, %c0_4] : memref<2x1024xf32, #tpu.memory_space<vmem>>, vector<2x1024xf32>
    tpu.vector_store %arg2[%c0_3, %c0_4], %7 {strides = array<i32>} : memref<2x1024xf32, #tpu.memory_space<vmem>>, vector<2x1024xf32>,
    return
  }
  func.func @transform_0(%arg0: i32) -> (i32, i32) {
    %c0_i32 = arith.constant 0 : i32
    %c0_i32_0 = arith.constant 0 : i32
    return %arg0, %c0_i32 : i32, i32
  }
  func.func @transform_1(%arg0: i32) -> (i32, i32) {
    %c0_i32 = arith.constant 0 : i32
    %c0_i32_0 = arith.constant 0 : i32
    return %arg0, %c0_i32 : i32, i32
  }
}

</mosaic_0001>

<bundles_post_ra>
// kernel: masking_layer.1
= control target key start
LH: loop header
LB: loop body
LE: loop exit
PB: predicated region body
PF: predicated region fallthrough
CT: control target
= control target key end

     0   :  { %s46_s0 = inlined_call_operand.vmem [shape: f32[2,1024], index: 0, kind: input, shape index: {}]   ;;  %s47_s1 = inlined_call_operand.vmem [shape: f32[2,1024], index: 1, kind: output, shape index: {}]  }
   0x1   :  { %v8_v0 = vld [vmem:[%s46_s0] sm:$0xff]  ;;  %v9_v1 = vld [vmem:[%s46_s0 + $0x8] sm:$0xff] }
   0x2   :  { %vm10_vm0 = vcmp.lt.f32.partialorder %v8_v0, 0.039215688  ;;  %vm12_vm1 = vcmp.gt.f32.partialorder %v8_v0, 0.11764706  ;;  %vm11_vm2 = vcmp.lt.f32.partialorder %v9_v1, 0.039215688 }
   0x3   :  { %vm14_vm3 = vmor %vm10_vm0, %vm12_vm1  ;;  %vm13_vm4 = vcmp.gt.f32.partialorder %v9_v1, 0.11764706 }
   0x4   :  { %v16_v2 = vsel %vm14_vm3, %v8_v0, 0.0  ;;  %vm15_vm5 = vmor %vm11_vm2, %vm13_vm4 }
   0x5   :  { %18 = vst [vmem:[%s47_s1] sm:$0xff] %v16_v2  ;;  %v17_v3 = vsel %vm15_vm5, %v9_v1, 0.0 }
   0x6   :  { %19 = vst [vmem:[%s47_s1 + $0x8] sm:$0xff] %v17_v3 }

</bundles_post_ra>
